<compile_context>
chip_gen: v6e
topology: v6e:2x2x1
jax: 0.10.0
libtpu: 0.0.40
codegen_flags: <defaults>
</compile_context>

<pallas_src>
import jax
import jax.numpy as jnp
from jax.experimental import pallas as pl
from jax.experimental.pallas import tpu as pltpu


# ----------------------------------------------------------------------------
# Fused kernel: backbone stand-in + time reductions + (folded) LayerNorm+Linear
# ----------------------------------------------------------------------------
def fused_sttn_adapter_kernel(x_ref, tmat_bd_ref, whb_ref, wob_ref, o_ref):
    TN, D = x_ref.shape                      # (T*N, D)
    N = o_ref.shape[0]
    T = TN // N
    D3 = 3 * D

    wh = whb_ref[0:D, :].astype(jnp.bfloat16)        # (D, D)   packed weights
    bh = whb_ref[D:D + 1, :]                         # (1, D)   f32 bias

    # ---------------- backbone stand-in (all VMEM resident) -----------------
    # Feature matmul over all T*N rows: one (128,32)@(32,32) bf16 dot.
    xw = jnp.dot(x_ref[...].astype(jnp.bfloat16), wh,
                 preferred_element_type=jnp.float32)          # (T*N, D) f32

    # Spatial mix for every time step at once: one (128,128)@(128,32) bf16 dot
    # against the block-diagonal kron(I_T, tmat).  ReLU + bias in f32.
    y = jnp.maximum(
        jnp.dot(tmat_bd_ref[...], xw.astype(jnp.bfloat16),
                preferred_element_type=jnp.float32) + bh, 0.0)  # (T*N, D) f32

    # ---------------- time reductions: last / mean / max ---------------------
    y3 = y.reshape(T, N, D)                           # leading-axis split only
    x_final = y3[T - 1]                               # (N, D)
    x_mean = jnp.sum(y3, axis=0) * (1.0 / T)          # (N, D)  pure VPU
    x_max = jnp.max(y3, axis=0)                       # (N, D)  ReLU >= 0

    # ---------------- readout: joint LN stats + single folded Linear --------
    z = jnp.concatenate([x_final, x_mean, x_max], axis=-1)     # (N, 3D)
    inv_d3 = 1.0 / D3
    mu = jnp.sum(z, axis=-1, keepdims=True) * inv_d3
    var = jnp.maximum(
        jnp.sum(z * z, axis=-1, keepdims=True) * inv_d3 - mu * mu, 0.0)
    z_hat = (z - mu) * jax.lax.rsqrt(var + 1e-5)                # pre-affine LN

    w = wob_ref[0:D3, :].astype(jnp.bfloat16)         # (3D, OUT_PAD) gamma-folded
    b = wob_ref[D3:D3 + 1, :]                         # (1, OUT_PAD)  beta-folded
    out = jnp.dot(z_hat.astype(jnp.bfloat16), w,
                  preferred_element_type=jnp.float32) + b       # (N, OUT_PAD)
    o_ref[...] = out.astype(o_ref.dtype)              # single unmasked slab store


def sttn_adapter_forward(x, params, out_dim):
    """x: (T, N, D) f32 -> (N, output_dim) f32.

    (PyTorch's trailing .squeeze(1) is a no-op for output_dim > 1.)
    """
    T, N, D = x.shape
    x2 = x.reshape(T * N, D)                 # free layout plumbing in wrapper
    out_pad = params["wob"].shape[-1]        # lane-padded output width
    vmem = pl.BlockSpec(memory_space=pltpu.MemorySpace.VMEM)
    out = pl.pallas_call(
        fused_sttn_adapter_kernel,
        out_shape=jax.ShapeDtypeStruct((N, out_pad), jnp.float32),
        in_specs=[vmem] * 4,
        out_specs=vmem,
    )(x2, params["tmat_bd"], params["whb"], params["wob"])
    return out[:, :out_dim]                  # drop lane padding outside kernel


# ----------------------------------------------------------------------------
# Parameters (deterministic, built in-script; folds done once here)
# ----------------------------------------------------------------------------
def build_params(T, N, D, out_dim):
    key = jax.random.PRNGKey(0)
    k_wh, k_bh, k_wo, k_bo, k_g, k_b = jax.random.split(key, 6)

    # Deterministic ring-graph adjacency with self loops -> row-normalized
    # random-walk transition matrix (calculate_transition_matrix equivalent).
    idx = jnp.arange(N)
    A = jnp.zeros((N, N), jnp.float32)
    A = A.at[idx, idx].set(1.0)
    A = A.at[idx, (idx + 1) % N].set(1.0)
    A = A.at[idx, (idx - 1) % N].set(1.0)
    tmat = A / jnp.sum(A, axis=1, keepdims=True)

    # Block-diagonal kron(I_T, tmat): the per-time spatial mix becomes a single
    # full-occupancy MXU dot.  Pre-cast to bf16 (MXU operand) to halve the DMA.
    tmat_bd = jnp.kron(jnp.eye(T, dtype=jnp.float32), tmat).astype(jnp.bfloat16)

    wh = jax.random.normal(k_wh, (D, D), jnp.float32) / jnp.sqrt(jnp.float32(D))
    bh = 0.1 * jax.random.normal(k_bh, (1, D), jnp.float32)
    whb = jnp.concatenate([wh, bh], axis=0)                    # packed (D+1, D)

    # LayerNorm(3D) affine (non-trivial values so the fold is exercised) and
    # nn.Linear(3D -> out_dim).
    gamma = 1.0 + 0.1 * jax.random.normal(k_g, (3 * D,), jnp.float32)
    beta = 0.1 * jax.random.normal(k_b, (3 * D,), jnp.float32)
    w_out = jax.random.normal(k_wo, (3 * D, out_dim), jnp.float32) / jnp.sqrt(
        jnp.float32(3 * D))
    b_out = 0.05 * jax.random.normal(k_bo, (1, out_dim), jnp.float32)

    # Fold LN affine into the readout: z_hat @ (gamma*W) + (b + beta@W).
    w_fold = gamma[:, None] * w_out                            # (3D, out)
    b_fold = b_out + beta[None, :] @ w_out                     # (1, out)

    # Lane-pad to a multiple of 128 so the kernel's final store is unmasked.
    out_pad = ((out_dim + 127) // 128) * 128
    w_fold_p = jnp.zeros((3 * D, out_pad), jnp.float32).at[:, :out_dim].set(w_fold)
    b_fold_p = jnp.zeros((1, out_pad), jnp.float32).at[:, :out_dim].set(b_fold)
    wob = jnp.concatenate([w_fold_p, b_fold_p], axis=0)        # (3D+1, OUT_PAD)

    return dict(tmat=tmat, tmat_bd=tmat_bd, wh=wh, bh=bh, whb=whb,
                gamma=gamma, beta=beta, w_out=w_out, b_out=b_out, wob=wob)


# ----------------------------------------------------------------------------
# Pure-JAX reference (unfolded LN + Linear, per-time tmat) for verification
# ----------------------------------------------------------------------------
def sttn_adapter_reference(x, params):
    T, N, D = x.shape
    bf = jnp.bfloat16
    xw = jnp.dot(x.reshape(T * N, D).astype(bf), params["wh"].astype(bf),
                 preferred_element_type=jnp.float32).reshape(T, N, D)
    y = jnp.maximum(
        jnp.einsum("nm,tmd->tnd", params["tmat"].astype(bf), xw.astype(bf),
                   preferred_element_type=jnp.float32) + params["bh"], 0.0)
    x_final, x_mean, x_max = y[-1], y.mean(axis=0), y.max(axis=0)
    feat = jnp.concatenate([x_final, x_mean, x_max], axis=-1)   # (N, 3D)
    mu = feat.mean(axis=-1, keepdims=True)
    var = feat.var(axis=-1, keepdims=True)
    normed = ((feat - mu) * jax.lax.rsqrt(var + 1e-5)
              * params["gamma"] + params["beta"])
    return jnp.dot(normed.astype(bf), params["w_out"].astype(bf),
                   preferred_element_type=jnp.float32) + params["b_out"]


if __name__ == "__main__":
    T, N, D, OUT = 8, 16, 32, 4  # seq_length, num_nodes_batched, hidden_dim, output_dim

    params = build_params(T, N, D, OUT)
    x = jax.random.normal(jax.random.PRNGKey(0), (T, N, D), jnp.float32)

    fwd = jax.jit(sttn_adapter_forward, static_argnums=2)
    out = jax.block_until_ready(fwd(x, params, OUT))

    ref = sttn_adapter_reference(x, params)
    assert out.shape == (N, OUT)
    assert jnp.all(jnp.isfinite(out))
    assert jnp.allclose(out, ref, rtol=2e-2, atol=2e-2), \
        float(jnp.max(jnp.abs(out - ref)))
    print("KERNEL_OK")
</pallas_src>

<mosaic_0001>
module attributes {stable_mosaic.version = 11 : i64} {
  func.func @fused_sttn_adapter_kernel(%arg0: memref<128x32xf32, #tpu.memory_space<vmem>>, %arg1: memref<128x128xbf16, #tpu.memory_space<vmem>>, %arg2: memref<33x32xf32, #tpu.memory_space<vmem>>, %arg3: memref<97x128xf32, #tpu.memory_space<vmem>>, %arg4: memref<16x128xf32, #tpu.memory_space<vmem>>) attributes {dimension_semantics = [], scalar_prefetch = 0 : i64, scratch_operands = 0 : i64, tpu.core_type = #tpu.core_type<tc>} {
    %c0 = arith.constant 0 : index
    %c0_0 = arith.constant 0 : index
    %0 = vector.load %arg2[%c0, %c0_0] : memref<33x32xf32, #tpu.memory_space<vmem>>, vector<32x32xf32>
    %1 = arith.truncf %0 : vector<32x32xf32> to vector<32x32xbf16>
    %c32 = arith.constant 32 : index
    %c0_1 = arith.constant 0 : index
    %2 = vector.load %arg2[%c32, %c0_1] : memref<33x32xf32, #tpu.memory_space<vmem>>, vector<1x32xf32>
    %c0_2 = arith.constant 0 : index
    %c0_3 = arith.constant 0 : index
    %3 = vector.load %arg0[%c0_2, %c0_3] : memref<128x32xf32, #tpu.memory_space<vmem>>, vector<128x32xf32>
    %4 = arith.truncf %3 : vector<128x32xf32> to vector<128x32xbf16>
    %cst = arith.constant dense<0.000000e+00> : vector<128x32xf32>
    %5 = tpu.matmul %4, %1, %cst {dimension_numbers = #tpu.dot_dimension_numbers<[1], [0], [0], [1], [0, 0, 1, 1], [], []>} : vector<128x32xbf16>, vector<32x32xbf16>, vector<128x32xf32> -> vector<128x32xf32>
    %c0_4 = arith.constant 0 : index
    %c0_5 = arith.constant 0 : index
    %6 = vector.load %arg1[%c0_4, %c0_5] : memref<128x128xbf16, #tpu.memory_space<vmem>>, vector<128x128xbf16>
    %7 = arith.truncf %5 : vector<128x32xf32> to vector<128x32xbf16>
    %cst_6 = arith.constant dense<0.000000e+00> : vector<128x32xf32>
    %8 = tpu.matmul %6, %7, %cst_6 {dimension_numbers = #tpu.dot_dimension_numbers<[1], [0], [0], [1], [0, 0, 1, 1], [], []>} : vector<128x128xbf16>, vector<128x32xbf16>, vector<128x32xf32> -> vector<128x32xf32>
    %9 = vector.broadcast %2 : vector<1x32xf32> to vector<128x32xf32>
    %10 = arith.addf %8, %9 : vector<128x32xf32>
    %cst_7 = arith.constant 0.000000e+00 : f32
    %11 = vector.broadcast %cst_7 : f32 to vector<128x32xf32>
    %12 = arith.maximumf %10, %11 : vector<128x32xf32>
    %13 = vector.shape_cast %12 : vector<128x32xf32> to vector<8x16x32xf32>
    %14 = vector.extract_strided_slice %13 {offsets = [7, 0, 0], sizes = [1, 16, 32], strides = [1, 1, 1]} : vector<8x16x32xf32> to vector<1x16x32xf32>
    %15 = vector.shape_cast %14 : vector<1x16x32xf32> to vector<16x32xf32>
    %cst_8 = arith.constant dense<0.000000e+00> : vector<16x32xf32>
    %16 = vector.multi_reduction <add>, %13, %cst_8 [0] : vector<8x16x32xf32> to vector<16x32xf32>
    %cst_9 = arith.constant 1.250000e-01 : f32
    %17 = vector.broadcast %cst_9 : f32 to vector<16x32xf32>
    %18 = arith.mulf %16, %17 : vector<16x32xf32>
    %cst_10 = arith.constant dense<0xFF800000> : vector<16x32xf32>
    %19 = vector.multi_reduction <maximumf>, %13, %cst_10 [0] : vector<8x16x32xf32> to vector<16x32xf32>
    %20 = tpu.concatenate %15, %18, %19 in 1 : vector<16x32xf32>, vector<16x32xf32>, vector<16x32xf32> -> vector<16x96xf32>
    %cst_11 = arith.constant dense<0.000000e+00> : vector<16xf32>
    %21 = vector.multi_reduction <add>, %20, %cst_11 [1] : vector<16x96xf32> to vector<16xf32>
    %22 = vector.shape_cast %21 : vector<16xf32> to vector<16x1xf32>
    %cst_12 = arith.constant 0.010416667 : f32
    %23 = vector.broadcast %cst_12 : f32 to vector<16x1xf32>
    %24 = arith.mulf %22, %23 : vector<16x1xf32>
    %25 = arith.mulf %20, %20 : vector<16x96xf32>
    %cst_13 = arith.constant dense<0.000000e+00> : vector<16xf32>
    %26 = vector.multi_reduction <add>, %25, %cst_13 [1] : vector<16x96xf32> to vector<16xf32>
    %27 = vector.shape_cast %26 : vector<16xf32> to vector<16x1xf32>
    %cst_14 = arith.constant 0.010416667 : f32
    %28 = vector.broadcast %cst_14 : f32 to vector<16x1xf32>
    %29 = arith.mulf %27, %28 : vector<16x1xf32>
    %30 = arith.mulf %24, %24 : vector<16x1xf32>
    %31 = arith.subf %29, %30 : vector<16x1xf32>
    %cst_15 = arith.constant 0.000000e+00 : f32
    %32 = vector.broadcast %cst_15 : f32 to vector<16x1xf32>
    %33 = arith.maximumf %31, %32 : vector<16x1xf32>
    %34 = vector.broadcast %24 : vector<16x1xf32> to vector<16x96xf32>
    %35 = arith.subf %20, %34 : vector<16x96xf32>
    %cst_16 = arith.constant 9.99999974E-6 : f32
    %36 = vector.broadcast %cst_16 : f32 to vector<16x1xf32>
    %37 = arith.addf %33, %36 : vector<16x1xf32>
    %38 = math.rsqrt %37 : vector<16x1xf32>
    %39 = vector.broadcast %38 : vector<16x1xf32> to vector<16x96xf32>
    %40 = arith.mulf %35, %39 : vector<16x96xf32>
    %c0_17 = arith.constant 0 : index
    %c0_18 = arith.constant 0 : index
    %41 = vector.load %arg3[%c0_17, %c0_18] : memref<97x128xf32, #tpu.memory_space<vmem>>, vector<96x128xf32>
    %42 = arith.truncf %41 : vector<96x128xf32> to vector<96x128xbf16>
    %c96 = arith.constant 96 : index
    %c0_19 = arith.constant 0 : index
    %43 = vector.load %arg3[%c96, %c0_19] : memref<97x128xf32, #tpu.memory_space<vmem>>, vector<1x128xf32>
    %44 = arith.truncf %40 : vector<16x96xf32> to vector<16x96xbf16>
    %cst_20 = arith.constant dense<0.000000e+00> : vector<16x128xf32>
    %45 = tpu.matmul %44, %42, %cst_20 {dimension_numbers = #tpu.dot_dimension_numbers<[1], [0], [0], [1], [0, 0, 1, 1], [], []>} : vector<16x96xbf16>, vector<96x128xbf16>, vector<16x128xf32> -> vector<16x128xf32>
    %46 = vector.broadcast %43 : vector<1x128xf32> to vector<16x128xf32>
    %47 = arith.addf %45, %46 : vector<16x128xf32>
    %c0_21 = arith.constant 0 : index
    %c0_22 = arith.constant 0 : index
    %48 = vector.load %arg4[%c0_21, %c0_22] : memref<16x128xf32, #tpu.memory_space<vmem>>, vector<16x128xf32>
    tpu.vector_store %arg4[%c0_21, %c0_22], %47 {strides = array<i32>} : memref<16x128xf32, #tpu.memory_space<vmem>>, vector<16x128xf32>,
    return
  }
}

</mosaic_0001>

<bundles_post_ra>
// kernel: sttn_adapter_forward.1
= control target key start
LH: loop header
LB: loop body
LE: loop exit
PB: predicated region body
PF: predicated region fallthrough
CT: control target
= control target key end

     0   :  { %9 = vsyncpa [#allocation3], 0  ;;  %s925_s0 = inlined_call_operand.hbm [shape: f32[128,32], index: 0, kind: input, shape index: {}]   ;;  %s926_s1 = inlined_call_operand.vmem [shape: bf16[128,128], index: 1, kind: input, shape index: {}]   ;;  %s927_s2 = inlined_call_operand.vmem [shape: f32[33,32], index: 2, kind: input, shape index: {}]   ;;  %s928_s3 = inlined_call_operand.hbm [shape: f32[97,128], index: 3, kind: input, shape index: {}]   ;;  %s929_s4 = inlined_call_operand.vmem [shape: f32[16,128], index: 4, kind: output, shape index: {}]  }
   0x1   :  { %10 = vsyncpa [#allocation5], 0  ;;  %s764_s15 = smov [#allocation2]  }
   0x2   :  { %s16_s16 = sshll.u32 %s764_s15, 4  ;;  %s17_s16 = int_to_ptr.vmem [resolvable:$true] %s16_s16 }
   0x3   :  { %s728_s17 = scalar_lea.vmem %s17_s16, 2048  ;;  %p733_p1 = scmp.lt.s32.totalorder %s17_s16, %s17_s16 }
   0x4   :  { %p729_p0 = scmp.ne.s32.totalorder %s17_s16, %s728_s17  ;;  %p734_p2 = scmp.lt.s32.totalorder %s728_s17, %s728_s17 }
   0x6   :  { %p735_p3 = por %p734_p2, %p733_p1 }
   0x8   :  { %p736_p4 = pnand %p735_p3, %p729_p0 }
   0xa   :  { %739 = shalt.err (!%p736_p4)
}
   0xb   :  { %s765_s18 = smov 128   ;;  %s766_s19 = smov 8  }
   0xc   :  { %22 = dma.hbm_to_vmem [thread:$0]  %s925_s0, 2048, %s17_s16, [#allocation3], %s765_s18, %s765_s18, %s766_s19  }
   0xd   :  { %s767_s22 = smov [#allocation4]  }
   0xe   :  { %s32_s23 = sshll.u32 %s767_s22, 4  ;;  %s33_s23 = int_to_ptr.vmem [resolvable:$true] %s32_s23 }
   0xf   :  { %s748_s24 = scalar_lea.vmem %s33_s23, 1664  ;;  %p753_p6 = scmp.lt.s32.totalorder %s33_s23, %s33_s23 }
  0x10   :  { %p749_p5 = scmp.ne.s32.totalorder %s33_s23, %s748_s24  ;;  %p754_p7 = scmp.lt.s32.totalorder %s748_s24, %s748_s24 }
  0x12   :  { %p755_p8 = por %p754_p7, %p753_p6 }
  0x14   :  { %p756_p9 = pnand %p755_p8, %p749_p5 }
  0x16   :  { %759 = shalt.err (!%p756_p9)
}
  0x17   :  { %38 = dma.hbm_to_vmem [thread:$0]  %s928_s3, 1664, %s33_s23, [#allocation5], %s765_s18, %s765_s18, %s766_s19  }
  0x18   :  { %760 = dma.done.wait [#allocation3], 2048  }
  0x19   :  { %761 = vsyncadd [#allocation3], 4294965248 }
  0x1a   :  { %762 = dma.done.wait [#allocation5], 1664  }
  0x1b   :  { %763 = vsyncadd [#allocation5], 4294965632  ;;  %v48_v0 = vld [vmem:[%s927_s2 + $0x10] sm:$0xff]  ;;  %v49_v1 = vld [vmem:[%s927_s2 + $0x18] sm:$0xff]  ;;  %vm77_vm0 = vcmask 261120   ;;  %vm468_vm1 = vcmask 523264  }
  0x1c   :  { %v46_v2 = vld [vmem:[%s927_s2] sm:$0xff]  ;;  %v51_v3 = vpack.c.bf16 %v49_v1, %v48_v0  ;;  %v47_v4 = vld [vmem:[%s927_s2 + $0x8] sm:$0xff]  ;;  %v55_v9 = vld [vmem:[#allocation2 + $0x10] sm:$0xff]  ;;  %vm471_vm2 = vcmask 785408   ;;  %vm771_vm3 = vmmov 0  }
  0x1d   :  { %v53_v5 = vld [vmem:[#allocation2] sm:$0xff]  ;;  %v54_v6 = vld [vmem:[#allocation2 + $0x8] sm:$0xff]  ;;  %v50_v7 = vpack.c.bf16 %v47_v4, %v46_v2  ;;  %v56_v10 = vld [vmem:[#allocation2 + $0x18] sm:$0xff] }
  0x1e   :  { %v69_v8 = vpack.c.bf16 %v54_v6, %v53_v5  ;;  %632 = vmatprep.subr.bf16.mxu0 %v51_v3  ;;  %v57_v11 = vld [vmem:[#allocation2 + $0x20] sm:$0xff]  ;;  %v58_v12 = vld [vmem:[#allocation2 + $0x28] sm:$0xff]  ;;  %v70_v13 = vpack.c.bf16 %v56_v10, %v55_v9  ;;  %v59_v15 = vld [vmem:[#allocation2 + $0x30] sm:$0xff] }
  0x1f   :  { %633 = vmatpush3.bf16.msra.mxu0 %v51_v3  ;;  %v71_v14 = vpack.c.bf16 %v58_v12, %v57_v11  ;;  %v60_v16 = vld [vmem:[#allocation2 + $0x38] sm:$0xff]  ;;  %v61_v17 = vld [vmem:[#allocation2 + $0x40] sm:$0xff]  ;;  %v62_v18 = vld [vmem:[#allocation2 + $0x48] sm:$0xff] }
  0x20   :  { %636 = vmatprep.mubr.msk.bf16.mxu0 %vm77_vm0, %v69_v8  ;;  %634 = vmatprep.subr.bf16.mxu0 %v50_v7  ;;  %v72_v19 = vpack.c.bf16 %v60_v16, %v59_v15  ;;  %v73_v20 = vpack.c.bf16 %v62_v18, %v61_v17  ;;  %v63_v21 = vld [vmem:[#allocation2 + $0x50] sm:$0xff]  ;;  %v64_v22 = vld [vmem:[#allocation2 + $0x58] sm:$0xff]  ;;  %v65_v23 = vld [vmem:[#allocation2 + $0x60] sm:$0xff] }
  0x21   :  { %v66_v24 = vld [vmem:[#allocation2 + $0x68] sm:$0xff]  ;;  %v74_v25 = vpack.c.bf16 %v64_v22, %v63_v21  ;;  %v67_v27 = vld [vmem:[#allocation2 + $0x70] sm:$0xff]  ;;  %v68_v28 = vld [vmem:[#allocation2 + $0x78] sm:$0xff] }
  0x22   :  { %v75_v26 = vpack.c.bf16 %v66_v24, %v65_v23  ;;  %v76_v29 = vpack.c.bf16 %v68_v28, %v67_v27  ;;  %v708_v30 = vld [vmem:[%s926_s1] sm:$0xff]   ;;  %v709_v55 = vld [vmem:[%s926_s1 + $0x8] sm:$0xff]   ;;  %v710_v56 = vld [vmem:[%s926_s1 + $0x10] sm:$0xff]  }
  0x23   :  { %635 = vmatpush3.bf16.msra.mxu0 %v50_v7  ;;  %668 = vmatprep.mubr.bf16.mxu1 %v708_v30  ;;  %v711_v57 = vld [vmem:[%s926_s1 + $0x18] sm:$0xff]   ;;  %v712_v58 = vld [vmem:[%s926_s1 + $0x20] sm:$0xff]   ;;  %v713_v59 = vld [vmem:[%s926_s1 + $0x28] sm:$0xff]  }
  0x24   :  { %v714_v60 = vld [vmem:[%s926_s1 + $0x30] sm:$0xff]   ;;  %v715_v61 = vld [vmem:[%s926_s1 + $0x38] sm:$0xff]   ;;  %v850_v1 = vld [vmem:[%s927_s2 + $0x20] ss:$0 sm:$0xff]  ;;  %s768_s1 = smov 64   ;;  %s769_s2 = smov 32  }
  0x26   :  { %637 = vmatmul.mubr.msk.bf16.vlgmr.msra.gmra.mxu0 %vm77_vm0, %v70_v13 }
  0x27   :  { %640 = vmatprep.mubr.msk.bf16.mxu0 %vm77_vm0, %v71_v14 }
  0x2e   :  { %641 = vmatmul.mubr.msk.bf16.gmra.mxu0 %vm77_vm0, %v72_v19 }
  0x2f   :  { %644 = vmatprep.mubr.msk.bf16.mxu0 %vm77_vm0, %v73_v20 }
  0x36   :  { %645 = vmatmul.mubr.msk.bf16.gmra.mxu0 %vm77_vm0, %v74_v25 }
  0x37   :  { %648 = vmatprep.mubr.msk.bf16.mxu0 %vm77_vm0, %v75_v26 }
  0x3e   :  { %649 = vmatmul.mubr.msk.bf16.gmra.mxu0 %vm77_vm0, %v76_v29 }
  0xe6   :  { %v638_v31 = vpop.f32.mrf.mxu0 }
  0xe8   :  { %v136_v32 = vpop.f32.mrf.mxu0 }
  0xea   :  { %v639_v33 = vpop.f32.mrf.mxu0 }
  0xeb   :  { %v216_v53 = vpack.c.bf16 %v639_v33, %v638_v31 }
  0xec   :  { %v139_v34 = vpop.f32.mrf.mxu0 }
  0xed   :  { %v215_v54 = vpack.c.bf16 %v139_v34, %v136_v32 }
  0xee   :  { %v642_v35 = vpop.f32.mrf.mxu0 }
  0xf0   :  { %v152_v36 = vpop.f32.mrf.mxu0 }
  0xf2   :  { %v643_v37 = vpop.f32.mrf.mxu0 }
  0xf3   :  { %v218_v51 = vpack.c.bf16 %v643_v37, %v642_v35 }
  0xf4   :  { %v155_v38 = vpop.f32.mrf.mxu0 }
  0xf5   :  { %v217_v52 = vpack.c.bf16 %v155_v38, %v152_v36 }
  0xf6   :  { %v646_v39 = vpop.f32.mrf.mxu0 }
  0xf8   :  { %v168_v40 = vpop.f32.mrf.mxu0 }
  0xfa   :  { %v647_v41 = vpop.f32.mrf.mxu0 }
  0xfb   :  { %v220_v49 = vpack.c.bf16 %v647_v41, %v646_v39 }
  0xfc   :  { %v171_v42 = vpop.f32.mrf.mxu0 }
  0xfd   :  { %v219_v50 = vpack.c.bf16 %v171_v42, %v168_v40 }
  0xfe   :  { %v650_v43 = vpop.f32.mrf.mxu0 }
 0x100   :  { %v184_v44 = vpop.f32.mrf.mxu0 }
 0x102   :  { %v651_v45 = vpop.f32.mrf.mxu0 }
 0x103   :  { %v222_v46 = vpack.c.bf16 %v651_v45, %v650_v43 }
 0x104   :  { %v187_v47 = vpop.f32.mrf.mxu0 }
 0x105   :  { %v221_v48 = vpack.c.bf16 %v187_v47, %v184_v44  ;;  %652 = vmatprep.subr.bf16.mxu1 %v222_v46 }
 0x106   :  { %653 = vmatpush3.bf16.msra.mxu1 %v222_v46 }
 0x107   :  { %654 = vmatprep.subr.bf16.mxu1 %v221_v48 }
 0x10a   :  { %655 = vmatpush3.bf16.msra.mxu1 %v221_v48 }
 0x10b   :  { %656 = vmatprep.subr.bf16.mxu1 %v220_v49 }
 0x10e   :  { %657 = vmatpush3.bf16.msra.mxu1 %v220_v49 }
 0x10f   :  { %658 = vmatprep.subr.bf16.mxu1 %v219_v50 }
 0x112   :  { %659 = vmatpush3.bf16.msra.mxu1 %v219_v50 }
 0x113   :  { %660 = vmatprep.subr.bf16.mxu1 %v218_v51 }
 0x116   :  { %661 = vmatpush3.bf16.msra.mxu1 %v218_v51 }
 0x117   :  { %662 = vmatprep.subr.bf16.mxu1 %v217_v52 }
 0x11a   :  { %663 = vmatpush3.bf16.msra.mxu1 %v217_v52 }
 0x11b   :  { %664 = vmatprep.subr.bf16.mxu1 %v216_v53 }
 0x11e   :  { %665 = vmatpush3.bf16.msra.mxu1 %v216_v53 }
 0x11f   :  { %666 = vmatprep.subr.bf16.mxu1 %v215_v54 }
 0x122   :  { %667 = vmatpush3.bf16.msra.mxu1 %v215_v54 }
 0x125   :  { %669 = vmatmul.mubr.bf16.vlgmr.msra.gmra.mxu1 %v709_v55 }
 0x126   :  { %672 = vmatprep.mubr.bf16.mxu1 %v710_v56 }
 0x12d   :  { %673 = vmatmul.mubr.bf16.gmra.mxu1 %v711_v57 }
 0x12e   :  { %676 = vmatprep.mubr.bf16.mxu1 %v712_v58 }
 0x135   :  { %677 = vmatmul.mubr.bf16.gmra.mxu1 %v713_v59 }
 0x136   :  { %680 = vmatprep.mubr.bf16.mxu1 %v714_v60 }
 0x13d   :  { %681 = vmatmul.mubr.bf16.gmra.mxu1 %v715_v61 }
 0x1e5   :  { %v670_v62 = vpop.f32.mrf.mxu1 }
 0x1e6   :  { %v318_v5 = vadd.f32 %v670_v62, %v850_v1 }
 0x1e7   :  { %v309_v63 = vpop.f32.mrf.mxu1 }
 0x1e8   :  { %v310_v3 = vadd.f32 %v850_v1, %v309_v63  ;;  %v374_v13 = vmax.f32 %v318_v5, 0.0 }
 0x1e9   :  { %v671_v0 = vpop.f32.mrf.mxu1 }
 0x1ea   :  { %v372_v7 = vmax.f32 %v310_v3, 0.0  ;;  %v321_v10 = vadd.f32 %v671_v0, %v850_v1  ;;  %v389_v23 = vsel %vm77_vm0, %v374_v13, 0.0  ;;  %v421_v29 = vsel %vm77_vm0, %v374_v13, -inf }
 0x1eb   :  { %v312_v2 = vpop.f32.mrf.mxu1 }
 0x1ec   :  { %v313_v8 = vadd.f32 %v850_v1, %v312_v2  ;;  %v388_v16 = vsel %vm77_vm0, %v372_v7, 0.0  ;;  %v375_v19 = vmax.f32 %v321_v10, 0.0  ;;  %v420_v30 = vsel %vm77_vm0, %v372_v7, -inf }
 0x1ed   :  { %v674_v4 = vpop.f32.mrf.mxu1  ;;  %v390_v27 = vadd.f32 %v389_v23, %v388_v16 }
 0x1ee   :  { %v334_v11 = vadd.f32 %v674_v4, %v850_v1  ;;  %v373_v17 = vmax.f32 %v313_v8, 0.0  ;;  %v404_v33 = vsel %vm77_vm0, %v375_v19, 0.0  ;;  %v436_v42 = vsel %vm77_vm0, %v375_v19, -inf }
 0x1ef   :  { %v325_v6 = vpop.f32.mrf.mxu1 }
 0x1f0   :  { %v326_v9 = vadd.f32 %v850_v1, %v325_v6  ;;  %v378_v20 = vmax.f32 %v334_v11, 0.0  ;;  %v403_v31 = vsel %vm77_vm0, %v373_v17, 0.0  ;;  %v435_v44 = vsel %vm77_vm0, %v373_v17, -inf }
 0x1f1   :  { %v675_v12 = vpop.f32.mrf.mxu1  ;;  %v405_v43 = vadd.f32 %v404_v33, %v403_v31 }
 0x1f2   :  { %v376_v14 = vmax.f32 %v326_v9, 0.0  ;;  %v337_v21 = vadd.f32 %v675_v12, %v850_v1  ;;  %v424_v34 = vsel %vm77_vm0, %v378_v20, -inf  ;;  %v393_v47 = vsel %vm77_vm0, %v378_v20, 0.0 }
 0x1f3   :  { %v328_v15 = vpop.f32.mrf.mxu1  ;;  %v425_v48 = vmax.f32 %v421_v29, %v424_v34 }
 0x1f4   :  { %v329_v18 = vadd.f32 %v850_v1, %v328_v15  ;;  %v391_v24 = vsel %vm77_vm0, %v376_v14, 0.0  ;;  %v379_v36 = vmax.f32 %v337_v21, 0.0  ;;  %v422_v38 = vsel %vm77_vm0, %v376_v14, -inf }
 0x1f5   :  { %v678_v22 = vpop.f32.mrf.mxu1  ;;  %v392_v35 = vadd.f32 %v391_v24, %v390_v27  ;;  %v423_v51 = vmax.f32 %v420_v30, %v422_v38 }
 0x1f6   :  { %v377_v25 = vmax.f32 %v329_v18, 0.0  ;;  %v350_v26 = vadd.f32 %v678_v22, %v850_v1  ;;  %v439_v52 = vsel %vm77_vm0, %v379_v36, -inf  ;;  %v408_v60 = vsel %vm77_vm0, %v379_v36, 0.0 }
 0x1f7   :  { %v341_v28 = vpop.f32.mrf.mxu1  ;;  %v394_v54 = vadd.f32 %v393_v47, %v392_v35  ;;  %v440_v2 = vmax.f32 %v436_v42, %v439_v52 }
 0x1f8   :  { %v342_v32 = vadd.f32 %v850_v1, %v341_v28  ;;  %v406_v39 = vsel %vm77_vm0, %v377_v25, 0.0  ;;  %v382_v40 = vmax.f32 %v350_v26, 0.0  ;;  %v437_v56 = vsel %vm77_vm0, %v377_v25, -inf }
 0x1f9   :  { %v679_v37 = vpop.f32.mrf.mxu1  ;;  %v407_v53 = vadd.f32 %v406_v39, %v405_v43  ;;  %v438_v6 = vmax.f32 %v435_v44, %v437_v56 }
 0x1fa   :  { %v380_v41 = vmax.f32 %v342_v32, 0.0  ;;  %v353_v45 = vadd.f32 %v679_v37, %v850_v1  ;;  %v428_v57 = vsel %vm77_vm0, %v382_v40, -inf  ;;  %v397_v7 = vsel %vm77_vm0, %v382_v40, 0.0 }
 0x1fb   :  { %v344_v46 = vpop.f32.mrf.mxu1  ;;  %v429_v8 = vmax.f32 %v425_v48, %v428_v57  ;;  %v409_v9 = vadd.f32 %v408_v60, %v407_v53  ;;  %v515_v60 = vld [vmem:[#allocation4 + $0x58] sm:$0xff] }
 0x1fc   :  { %v395_v49 = vsel %vm77_vm0, %v380_v41, 0.0  ;;  %v345_v50 = vadd.f32 %v850_v1, %v344_v46  ;;  %v426_v62 = vsel %vm77_vm0, %v380_v41, -inf  ;;  %v383_v63 = vmax.f32 %v353_v45, 0.0 }
 0x1fd   :  { %v682_v55 = vpop.f32.mrf.mxu1  ;;  %v396_v61 = vadd.f32 %v395_v49, %v394_v54  ;;  %v427_v11 = vmax.f32 %v423_v51, %v426_v62 }
 0x1fe   :  { %v381_v58 = vmax.f32 %v345_v50, 0.0  ;;  %v366_v59 = vadd.f32 %v682_v55, %v850_v1  ;;  %v443_v15 = vsel %vm77_vm0, %v383_v63, -inf  ;;  %v412_v24 = vsel %vm77_vm0, %v383_v63, 0.0  ;;  %v512_v63 = vld [vmem:[#allocation4 + $0x40] sm:$0xff] }
 0x1ff   :  { %v357_v0 = vpop.f32.mrf.mxu1  ;;  %v398_v19 = vadd.f32 %v397_v7, %v396_v61  ;;  %v444_v28 = vmax.f32 %v440_v2, %v443_v15  ;;  %v770_v61 = vmov 0.0   ;;  %v509_v7 = vld [vmem:[#allocation4 + $0x28] sm:$0xff] }
 0x200   :  { %v410_v3 = vsel %vm77_vm0, %v381_v58, 0.0  ;;  %v386_v4 = vmax.f32 %v366_v59, 0.0  ;;  %v358_v5 = vadd.f32 %v850_v1, %v357_v0  ;;  %v441_v17 = vsel %vm77_vm0, %v381_v58, -inf  ;;  %v514_v59 = vld [vmem:[#allocation4 + $0x50] sm:$0xff]  ;;  %684 = vmatprep.subr.bf16.mxu0 %v770_v61  ;;  %v513_v0 = vld [vmem:[#allocation4 + $0x48] sm:$0xff]  ;;  %696 = vmatprep.mubr.msk.bf16.mxu0 %vm771_vm3, %v770_v61 }
 0x201   :  { %v683_v10 = vpop.f32.mrf.mxu1  ;;  %v411_v16 = vadd.f32 %v410_v3, %v409_v9  ;;  %v442_v32 = vmax.f32 %v438_v6, %v441_v17  ;;  %v521_v62 = vpack.c.bf16 %v515_v60, %v514_v59  ;;  %v520_v2 = vpack.c.bf16 %v513_v0, %v512_v63  ;;  %v510_v3 = vld [vmem:[#allocation4 + $0x30] sm:$0xff]  ;;  %v508_v6 = vld [vmem:[#allocation4 + $0x20] sm:$0xff] }
 0x202   :  { %v384_v12 = vmax.f32 %v358_v5, 0.0  ;;  %v369_v13 = vadd.f32 %v683_v10, %v850_v1  ;;  %v432_v14 = vsel %vm77_vm0, %v386_v4, -inf  ;;  %v401_v31 = vsel %vm77_vm0, %v386_v4, 0.0  ;;  %v506_v9 = vld [vmem:[#allocation4 + $0x10] sm:$0xff]  ;;  %v507_v10 = vld [vmem:[#allocation4 + $0x18] sm:$0xff] }
 0x203   :  { %v360_v18 = vpop.f32.mrf.mxu1  ;;  %v433_v26 = vmax.f32 %v429_v8, %v432_v14  ;;  %v413_v33 = vadd.f32 %v412_v24, %v411_v16  ;;  %685 = vmatpush3.bf16.msra.mxu0 %v521_v62  ;;  %v518_v8 = vpack.c.bf16 %v509_v7, %v508_v6 }
 0x204   :  { %v399_v20 = vsel %vm77_vm0, %v384_v12, 0.0  ;;  %v430_v21 = vsel %vm77_vm0, %v384_v12, -inf  ;;  %v387_v22 = vmax.f32 %v369_v13, 0.0  ;;  %v361_v23 = vadd.f32 %v850_v1, %v360_v18  ;;  %686 = vmatprep.subr.bf16.mxu0 %v770_v61  ;;  %v504_v12 = vld [vmem:[#allocation4] sm:$0xff]  ;;  %v505_v13 = vld [vmem:[#allocation4 + $0x8] sm:$0xff] }
 0x205   :  { %v431_v25 = vmax.f32 %v427_v11, %v430_v21  ;;  %v400_v27 = vadd.f32 %v399_v20, %v398_v19  ;;  %v517_v11 = vpack.c.bf16 %v507_v10, %v506_v9  ;;  %v516_v14 = vpack.c.bf16 %v505_v13, %v504_v12 }
 0x206   :  { %v447_v29 = vsel %vm77_vm0, %v387_v22, -inf  ;;  %v385_v30 = vmax.f32 %v361_v23, 0.0  ;;  %v416_v41 = vsel %vm77_vm0, %v387_v22, 0.0 }
 0x207   :  { %v434_v34 = vmax.f32 %v431_v25, %v433_v26  ;;  %v402_v35 = vadd.f32 %v401_v31, %v400_v27  ;;  %v448_v40 = vmax.f32 %v444_v28, %v447_v29  ;;  %687 = vmatpush3.bf16.msra.mxu0 %v520_v2 }
 0x208   :  { %v414_v36 = vsel %vm77_vm0, %v385_v30, 0.0  ;;  %v445_v37 = vsel %vm77_vm0, %v385_v30, -inf  ;;  %688 = vmatprep.subr.bf16.mxu0 %v770_v61 }
 0x209   :  { %v415_v1 = vadd.f32 %v414_v36, %v413_v33  ;;  %v446_v38 = vmax.f32 %v442_v32, %v445_v37  ;;  %460 = vrot.lane.b32.xlu1 %v434_v34, %s768_s1  ;;  %v418_v39 = vmul.f32 0.125, %v402_v35 }
 0x20b   :  { %452 = vrot.lane.b32.xlu0 %v418_v39, %s769_s2  ;;  %v449_v42 = vmax.f32 %v446_v38, %v448_v40  ;;  %v417_v43 = vadd.f32 %v416_v41, %v415_v1  ;;  %v597_v1 = vld [vmem:[#allocation4 + $0x60] ss:$0 sm:$0xff] }
 0x20d   :  { %462 = vrot.lane.b32.xlu1 %v449_v42, %s768_s1  ;;  %v419_v44 = vmul.f32 0.125, %v417_v43 }
 0x20f   :  { %454 = vrot.lane.b32.xlu0 %v419_v44, %s769_s2 }
 0x27b   :  { %v461_v45 = vpop.permute.xlu1 %460 }
 0x27d   :  { %v453_v46 = vpop.permute.xlu0 %452 }
 0x27e   :  { %v466_v47 = vsel %vm77_vm0, %v386_v4, %v453_v46  ;;  %v511_v4 = vld [vmem:[#allocation4 + $0x38] sm:$0xff] }
 0x27f   :  { %v901_v48 = vsel %vm468_vm1, %v466_v47, %v461_v45  ;;  %v463_v52 = vpop.permute.xlu1 %462  ;;  %v519_v5 = vpack.c.bf16 %v511_v4, %v510_v3 }
 0x280   :  { %v472_v49 = vsel %vm471_vm2, %v901_v48, 0.0  ;;  %v480_v50 = vmul.f32 %v901_v48, %v901_v48 }
 0x281   :  { %473 = vadd.xlane.f32.xlu0 %v472_v49  ;;  %v455_v51 = vpop.permute.xlu0 %454  ;;  %689 = vmatpush3.bf16.msra.mxu0 %v519_v5 }
 0x282   :  { %v467_v53 = vsel %vm77_vm0, %v387_v22, %v455_v51  ;;  %v482_v55 = vsel %vm471_vm2, %v480_v50, 0.0  ;;  %690 = vmatprep.subr.bf16.mxu0 %v770_v61 }
 0x283   :  { %v908_v54 = vsel %vm468_vm1, %v467_v53, %v463_v52 }
 0x284   :  { %v475_v56 = vsel %vm471_vm2, %v908_v54, 0.0  ;;  %v481_v57 = vmul.f32 %v908_v54, %v908_v54 }
 0x285   :  { %483 = vadd.xlane.f32.xlu0 %v482_v55  ;;  %476 = vadd.xlane.f32.xlu1 %v475_v56 }
 0x286   :  { %v485_v58 = vsel %vm471_vm2, %v481_v57, 0.0  ;;  %691 = vmatpush3.bf16.msra.mxu0 %v518_v8 }
 0x287   :  { %692 = vmatprep.subr.bf16.mxu0 %v770_v61 }
 0x289   :  { %486 = vadd.xlane.f32.xlu0 %v485_v58 }
 0x28a   :  { %693 = vmatpush3.bf16.msra.mxu0 %v517_v11 }
 0x28b   :  { %694 = vmatprep.subr.bf16.mxu0 %v770_v61 }
 0x28e   :  { %695 = vmatpush3.bf16.msra.mxu0 %v516_v14 }
 0x30a   :  { %v474_v15 = vpop.xlane.xlu0 %473 }
 0x30b   :  { %v478_v16 = vmul.f32 0.010416667, %v474_v15 }
 0x30d   :  { %v490_v19 = vmul.f32 %v478_v16, %v478_v16  ;;  %v496_v32 = vsub.f32 %v901_v48, %v478_v16 }
 0x30e   :  { %v477_v17 = vpop.xlane.xlu1 %476  ;;  %v484_v18 = vpop.xlane.xlu0 %483 }
 0x30f   :  { %v479_v20 = vmul.f32 0.010416667, %v477_v17  ;;  %v488_v21 = vmul.f32 0.010416667, %v484_v18 }
 0x311   :  { %v492_v22 = vsub.f32 %v488_v21, %v490_v19  ;;  %v491_v24 = vmul.f32 %v479_v20, %v479_v20  ;;  %v497_v33 = vsub.f32 %v908_v54, %v479_v20 }
 0x312   :  { %v487_v23 = vpop.xlane.xlu0 %486 }
 0x313   :  { %v494_v25 = vmax.f32 %v492_v22, 0.0  ;;  %v489_v26 = vmul.f32 0.010416667, %v487_v23 }
 0x315   :  { %v498_v27 = vadd.f32 1e-05, %v494_v25  ;;  %v493_v28 = vsub.f32 %v489_v26, %v491_v24 }
 0x317   :  { %v495_v29 = vmax.f32 %v493_v28, 0.0  ;;  %716 = vrsqrt.f32 %v498_v27 }
 0x319   :  { %v499_v30 = vadd.f32 1e-05, %v495_v29 }
 0x31b   :  { %718 = vrsqrt.f32 %v499_v30 }
 0x324   :  { %v717_v31 = vpop.eup %716 }
 0x325   :  { %v502_v35 = vmul.f32 %v717_v31, %v496_v32 }
 0x328   :  { %v719_v34 = vpop.eup %718 }
 0x329   :  { %v503_v36 = vmul.f32 %v719_v34, %v497_v33 }
 0x32b   :  { %v523_v37 = vpack.c.bf16 %v503_v36, %v502_v35 }
 0x32d   :  { %697 = vmatmul.mubr.msk.bf16.vlgmr.msra.gmra.mxu0 %vm471_vm2, %v523_v37 }
 0x3ed   :  { %v565_v38 = vpop.f32.mrf.mxu0 }
 0x3ee   :  { %v566_v39 = vadd.f32 %v597_v1, %v565_v38 }
 0x3ef   :  { %v698_v40 = vpop.f32.mrf.mxu0 }
 0x3f0   :  { %572 = vst [vmem:[%s929_s4] sm:$0xff] %v566_v39 }
 0x3f1   :  { %v568_v41 = vpop.f32.mrf.mxu0 }
 0x3f2   :  { %v569_v42 = vadd.f32 %v597_v1, %v568_v41 }
 0x3f3   :  { %v699_v43 = vpop.f32.mrf.mxu0 }
 0x3f4   :  { %573 = vst [vmem:[%s929_s4 + $0x8] sm:$0xff] %v569_v42 }
 0x3f5   :  { %578 = vsyncpa [#allocation3], 1 }
 0x3f6   :  { %579 = vsyncpa [#allocation5], 1 }

</bundles_post_ra>
